<compile_context>
chip_gen: v7x
topology: tpu7x:2x2x1
jax: 0.10.0
libtpu: 0.0.40
codegen_flags: <defaults>
</compile_context>

<pallas_src>
import numpy as np
import jax
import jax.numpy as jnp
from jax import lax
from jax.experimental import pallas as pl
from jax.experimental.pallas import tpu as pltpu

# ---------------- configuration (small, consistent with the module) -------------
N = 2           # batch
C_IN = 4        # in_type channels
H = W = 16      # spatial
GROWTH = 4      # channels added by each concat layer
NUM_CONCAT = 2  # number of concat factories
C_OUT = 8       # out_type channels
BN_EPS = 1e-5

WCI = W * C_IN      # 64   input lanes per row
WG = W * GROWTH     # 64   concat-layer output lanes per row
WCO = W * C_OUT     # 128  gather output lanes per row (lane-dense)


# ---------------- fused Pallas kernel: whole dense block for one image ----------
def _dense_block_kernel(x_ref, mc_ref, s12_ref, m2y_ref,
                        gx_ref, gy1_ref, gy2_ref, b_ref, o_ref, y1_ref):
    # x_ref:   (H+2, WCI)       H-halo-padded input, lanes = w*C_IN + c
    # mc_ref:  (3, WCI, 2*WG)   per-dy banded weights [layer1 | layer2-x-part], BN folded
    # s12_ref: (1, 2*WG)        folded BN shifts [layer1 | layer2], broadcast over w
    # m2y_ref: (3, WG, WG)      per-dy banded weights for layer2's y1 part
    # g*_ref:  (*, WCO)         block-diagonal 1x1 gather weights (per concat part)
    # b_ref:   (1, WCO)         gather bias broadcast over w
    # o_ref:   (H, WCO)         lane-dense output block (last dim 128)
    # y1_ref:  (H+2, WG)        VMEM scratch for layer-1 output with zero H halo

    # ---- layer-1 conv and the x-part of layer-2 conv, fused (lane-dense RHS) ----
    acc = jnp.zeros((H, 2 * WG), jnp.float32)
    for dy in range(3):
        acc += jnp.dot(x_ref[pl.ds(dy, H), :], mc_ref[dy],
                       preferred_element_type=jnp.float32)
    acc += s12_ref[...]                          # BN shifts for both layers
    y1 = jnp.maximum(acc[:, :WG], 0.0)           # concat layer 1: relu(bn(conv(x)))
    acc2 = acc[:, WG:]                           # layer-2 pre-activation, x-part + shift

    # stash y1 with zero H-halo rows so layer 2 can take row-shifted slices.
    # Only the halo rows need zeroing (middle rows are fully overwritten); doing it
    # every step keeps this correct when the grid axis is split across cores.
    zero_row = jnp.zeros((1, WG), jnp.float32)
    y1_ref[pl.ds(0, 1), :] = zero_row
    y1_ref[pl.ds(H + 1, 1), :] = zero_row
    y1_ref[pl.ds(1, H), :] = y1

    # ---- layer 2, y1 part: concat(x, y1) @ W2 == x @ W2x + y1 @ W2y ----
    for dy in range(3):
        acc2 = acc2 + jnp.dot(y1_ref[pl.ds(dy, H), :], m2y_ref[dy],
                              preferred_element_type=jnp.float32)
    y2 = jnp.maximum(acc2, 0.0)

    # ---- gather: 1x1 conv + bias over concat(x, y1, y2), as summed matmuls ----
    out = jnp.dot(x_ref[pl.ds(1, H), :], gx_ref[...],
                  preferred_element_type=jnp.float32)
    out += jnp.dot(y1, gy1_ref[...], preferred_element_type=jnp.float32)
    out += jnp.dot(y2, gy2_ref[...], preferred_element_type=jnp.float32)
    o_ref[...] = (out + b_ref[...]).astype(o_ref.dtype)


# ---------------- wrapper-side one-time weight packing ---------------------------
def _conv_band_matrices(w3_hwio):
    """(3,3,Cin,G) HWIO conv kernel -> (3, W*Cin, W*G) per-dy banded matmul weights.

    M[dy, (w+dx-1)*Cin + c, w*G + g] = K[dy, dx, c, g] for 0 <= w+dx-1 < W
    (out-of-range entries stay zero, which implements the pad=1 zero padding in W).
    """
    _, _, cin, g = w3_hwio.shape
    sel = np.zeros((W, W, 3), np.float32)          # sel[src_w, out_w, dx]
    for dx in range(3):
        for w in range(W):
            src = w + dx - 1
            if 0 <= src < W:
                sel[src, w, dx] = 1.0
    m = jnp.einsum("swd,ydcg->yscwg", jnp.asarray(sel), w3_hwio)
    return m.reshape(3, W * cin, W * g)


def _gather_block_diag(wg_part):
    """(Cin_part, C_OUT) 1x1-conv weights -> (W*Cin_part, W*C_OUT) block-diagonal."""
    cin, cout = wg_part.shape
    m = jnp.einsum("wv,co->wcvo", jnp.eye(W, dtype=wg_part.dtype), wg_part)
    return m.reshape(W * cin, W * cout)


# ---------------- SymDenseBlock forward (fused Pallas) ---------------------------
def sym_dense_block_forward(x_nchw, params):
    n = x_nchw.shape[0]
    p1, p2 = params["concats"]

    # Fold BN scale into conv weights; build banded / block-diagonal matmul operands.
    m1 = _conv_band_matrices(p1["w"] * p1["scale"])            # (3, WCI, WG)
    w2 = p2["w"] * p2["scale"]
    m2x = _conv_band_matrices(w2[:, :, :C_IN, :])              # (3, WCI, WG)
    m2y = _conv_band_matrices(w2[:, :, C_IN:, :])              # (3, WG,  WG)
    mc = jnp.concatenate([m1, m2x], axis=-1)                   # (3, WCI, 2*WG) lane-dense
    s12 = jnp.concatenate([jnp.tile(p1["shift"], W),
                           jnp.tile(p2["shift"], W)])[None, :]  # (1, 2*WG)
    wg = params["gather_w"]
    gx = _gather_block_diag(wg[:C_IN])                          # (WCI, WCO)
    gy1 = _gather_block_diag(wg[C_IN:C_IN + GROWTH])            # (WG,  WCO)
    gy2 = _gather_block_diag(wg[C_IN + GROWTH:])                # (WG,  WCO)
    brow = jnp.tile(params["gather_b"], W)[None, :]             # (1, WCO)

    # Input: NCHW -> per-image (H+2, W*C_IN); H halo padded, lanes = w*C_IN + c.
    x = jnp.transpose(x_nchw, (0, 2, 3, 1))                     # NHWC
    xp = jnp.pad(x, ((0, 0), (1, 1), (0, 0), (0, 0))).reshape(n, H + 2, WCI)

    out = pl.pallas_call(
        _dense_block_kernel,
        out_shape=jax.ShapeDtypeStruct((n, H, WCO), jnp.float32),
        grid_spec=pltpu.PrefetchScalarGridSpec(
            num_scalar_prefetch=0,
            grid=(n,),
            in_specs=[
                pl.BlockSpec((None, H + 2, WCI), lambda i: (i, 0, 0)),
                pl.BlockSpec((3, WCI, 2 * WG), lambda i: (0, 0, 0)),
                pl.BlockSpec((1, 2 * WG), lambda i: (0, 0)),
                pl.BlockSpec((3, WG, WG), lambda i: (0, 0, 0)),
                pl.BlockSpec((WCI, WCO), lambda i: (0, 0)),
                pl.BlockSpec((WG, WCO), lambda i: (0, 0)),
                pl.BlockSpec((WG, WCO), lambda i: (0, 0)),
                pl.BlockSpec((1, WCO), lambda i: (0, 0)),
            ],
            out_specs=pl.BlockSpec((None, H, WCO), lambda i: (i, 0, 0)),
            scratch_shapes=[pltpu.VMEM((H + 2, WG), jnp.float32)],
        ),
        compiler_params=pltpu.CompilerParams(
            dimension_semantics=("parallel",)),
    )(xp, mc, s12, m2y, gx, gy1, gy2, brow)

    out = out.reshape(n, H, W, C_OUT)                           # lanes were w*C_OUT+o
    return jnp.transpose(out, (0, 3, 1, 2))                     # NHWC -> NCHW


# ---------------- pure-JAX reference (for correctness check) --------------------
def sym_dense_block_reference(x_nchw, params):
    x = jnp.transpose(x_nchw, (0, 2, 3, 1))
    for p in params["concats"]:
        y = lax.conv_general_dilated(
            x, p["w"], window_strides=(1, 1), padding="SAME",
            dimension_numbers=("NHWC", "HWIO", "NHWC"))
        y = jnp.maximum(y * p["scale"] + p["shift"], 0.0)
        x = jnp.concatenate([x, y], axis=-1)
    out = jnp.einsum("nhwc,co->nhwo", x, params["gather_w"]) + params["gather_b"]
    return jnp.transpose(out, (0, 3, 1, 2))


# ---------------- deterministic parameter initialization ------------------------
def init_params(key):
    params = {"concats": []}
    c = C_IN
    for _ in range(NUM_CONCAT):
        key, k1, k2, k3, k4, k5 = jax.random.split(key, 6)
        w = 0.1 * jax.random.normal(k1, (3, 3, c, GROWTH), jnp.float32)  # HWIO
        gamma = 1.0 + 0.1 * jax.random.normal(k2, (GROWTH,), jnp.float32)
        beta = 0.1 * jax.random.normal(k3, (GROWTH,), jnp.float32)
        rmean = 0.1 * jax.random.normal(k4, (GROWTH,), jnp.float32)
        rvar = jnp.abs(jax.random.normal(k5, (GROWTH,), jnp.float32)) + 0.5
        scale = gamma / jnp.sqrt(rvar + BN_EPS)       # folded BN (eval mode)
        shift = beta - rmean * scale
        params["concats"].append({"w": w, "scale": scale, "shift": shift})
        c += GROWTH
    key, kg, kb = jax.random.split(key, 3)
    params["gather_w"] = 0.1 * jax.random.normal(kg, (c, C_OUT), jnp.float32)
    params["gather_b"] = 0.1 * jax.random.normal(kb, (C_OUT,), jnp.float32)
    return params


if __name__ == "__main__":
    key = jax.random.PRNGKey(0)
    key, kx, kp = jax.random.split(key, 3)
    x = jax.random.normal(kx, (N, C_IN, H, W), jnp.float32)   # NCHW, like PyTorch
    params = init_params(kp)

    out = jax.jit(sym_dense_block_forward)(x, params)
    out = jax.block_until_ready(out)

    ref = sym_dense_block_reference(x, params)
    assert out.shape == (N, C_OUT, H, W), out.shape
    assert jnp.allclose(out, ref, atol=1e-4, rtol=1e-4), (
        float(jnp.max(jnp.abs(out - ref))))

    print("KERNEL_OK")
</pallas_src>

<mosaic_0001>
module attributes {stable_mosaic.version = 11 : i64} {
  func.func @_dense_block_kernel(%arg0: i32, %arg1: memref<1x18x64xf32, #tpu.memory_space<vmem>>, %arg2: memref<3x64x128xf32, #tpu.memory_space<vmem>>, %arg3: memref<1x128xf32, #tpu.memory_space<vmem>>, %arg4: memref<3x64x64xf32, #tpu.memory_space<vmem>>, %arg5: memref<64x128xf32, #tpu.memory_space<vmem>>, %arg6: memref<64x128xf32, #tpu.memory_space<vmem>>, %arg7: memref<64x128xf32, #tpu.memory_space<vmem>>, %arg8: memref<1x128xf32, #tpu.memory_space<vmem>>, %arg9: memref<1x16x128xf32, #tpu.memory_space<vmem>>, %arg10: memref<18x64xf32, #tpu.memory_space<vmem>>) attributes {dimension_semantics = [#tpu.dimension_semantics<parallel>], iteration_bounds = array<i64: 2>, scalar_prefetch = 0 : i64, scratch_operands = 1 : i64, tpu.core_type = #tpu.core_type<tc>, window_params = [{transform_indices = @transform_0, window_bounds = array<i64: 1, 18, 64>}, {pipeline_mode = #tpu.pipeline_mode<synchronous>, transform_indices = @transform_1, window_bounds = array<i64: 3, 64, 128>}, {pipeline_mode = #tpu.pipeline_mode<synchronous>, transform_indices = @transform_2, window_bounds = array<i64: 1, 128>}, {pipeline_mode = #tpu.pipeline_mode<synchronous>, transform_indices = @transform_3, window_bounds = array<i64: 3, 64, 64>}, {pipeline_mode = #tpu.pipeline_mode<synchronous>, transform_indices = @transform_4, window_bounds = array<i64: 64, 128>}, {pipeline_mode = #tpu.pipeline_mode<synchronous>, transform_indices = @transform_5, window_bounds = array<i64: 64, 128>}, {pipeline_mode = #tpu.pipeline_mode<synchronous>, transform_indices = @transform_6, window_bounds = array<i64: 64, 128>}, {pipeline_mode = #tpu.pipeline_mode<synchronous>, transform_indices = @transform_7, window_bounds = array<i64: 1, 128>}, {transform_indices = @transform_8, window_bounds = array<i64: 1, 16, 128>}]} {
    %cst = arith.constant 0.000000e+00 : f32
    %0 = vector.broadcast %cst : f32 to vector<16x128xf32>
    %c0 = arith.constant 0 : index
    %c0_0 = arith.constant 0 : index
    %c0_1 = arith.constant 0 : index
    %1 = vector.load %arg1[%c0, %c0_0, %c0_1] : memref<1x18x64xf32, #tpu.memory_space<vmem>>, vector<1x16x64xf32>
    %2 = vector.shape_cast %1 : vector<1x16x64xf32> to vector<16x64xf32>
    %c0_2 = arith.constant 0 : index
    %c0_3 = arith.constant 0 : index
    %c0_4 = arith.constant 0 : index
    %3 = vector.load %arg2[%c0_2, %c0_3, %c0_4] : memref<3x64x128xf32, #tpu.memory_space<vmem>>, vector<1x64x128xf32>
    %4 = vector.shape_cast %3 : vector<1x64x128xf32> to vector<64x128xf32>
    %cst_5 = arith.constant dense<0.000000e+00> : vector<16x128xf32>
    %5 = tpu.matmul %2, %4, %cst_5 {dimension_numbers = #tpu.dot_dimension_numbers<[1], [0], [0], [1], [0, 0, 1, 1], [], []>} : vector<16x64xf32>, vector<64x128xf32>, vector<16x128xf32> -> vector<16x128xf32>
    %6 = arith.addf %0, %5 : vector<16x128xf32>
    %c0_6 = arith.constant 0 : index
    %c1 = arith.constant 1 : index
    %c0_7 = arith.constant 0 : index
    %7 = vector.load %arg1[%c0_6, %c1, %c0_7] : memref<1x18x64xf32, #tpu.memory_space<vmem>>, vector<1x16x64xf32>
    %8 = vector.shape_cast %7 : vector<1x16x64xf32> to vector<16x64xf32>
    %c1_8 = arith.constant 1 : index
    %c0_9 = arith.constant 0 : index
    %c0_10 = arith.constant 0 : index
    %9 = vector.load %arg2[%c1_8, %c0_9, %c0_10] : memref<3x64x128xf32, #tpu.memory_space<vmem>>, vector<1x64x128xf32>
    %10 = vector.shape_cast %9 : vector<1x64x128xf32> to vector<64x128xf32>
    %cst_11 = arith.constant dense<0.000000e+00> : vector<16x128xf32>
    %11 = tpu.matmul %8, %10, %cst_11 {dimension_numbers = #tpu.dot_dimension_numbers<[1], [0], [0], [1], [0, 0, 1, 1], [], []>} : vector<16x64xf32>, vector<64x128xf32>, vector<16x128xf32> -> vector<16x128xf32>
    %12 = arith.addf %6, %11 : vector<16x128xf32>
    %c0_12 = arith.constant 0 : index
    %c2 = arith.constant 2 : index
    %c0_13 = arith.constant 0 : index
    %13 = vector.load %arg1[%c0_12, %c2, %c0_13] : memref<1x18x64xf32, #tpu.memory_space<vmem>>, vector<1x16x64xf32>
    %14 = vector.shape_cast %13 : vector<1x16x64xf32> to vector<16x64xf32>
    %c2_14 = arith.constant 2 : index
    %c0_15 = arith.constant 0 : index
    %c0_16 = arith.constant 0 : index
    %15 = vector.load %arg2[%c2_14, %c0_15, %c0_16] : memref<3x64x128xf32, #tpu.memory_space<vmem>>, vector<1x64x128xf32>
    %16 = vector.shape_cast %15 : vector<1x64x128xf32> to vector<64x128xf32>
    %cst_17 = arith.constant dense<0.000000e+00> : vector<16x128xf32>
    %17 = tpu.matmul %14, %16, %cst_17 {dimension_numbers = #tpu.dot_dimension_numbers<[1], [0], [0], [1], [0, 0, 1, 1], [], []>} : vector<16x64xf32>, vector<64x128xf32>, vector<16x128xf32> -> vector<16x128xf32>
    %18 = arith.addf %12, %17 : vector<16x128xf32>
    %c0_18 = arith.constant 0 : index
    %c0_19 = arith.constant 0 : index
    %19 = vector.load %arg3[%c0_18, %c0_19] : memref<1x128xf32, #tpu.memory_space<vmem>>, vector<1x128xf32>
    %20 = vector.broadcast %19 : vector<1x128xf32> to vector<16x128xf32>
    %21 = arith.addf %18, %20 : vector<16x128xf32>
    %22 = vector.extract_strided_slice %21 {offsets = [0, 0], sizes = [16, 64], strides = [1, 1]} : vector<16x128xf32> to vector<16x64xf32>
    %cst_20 = arith.constant 0.000000e+00 : f32
    %23 = vector.broadcast %cst_20 : f32 to vector<16x64xf32>
    %24 = arith.maximumf %22, %23 : vector<16x64xf32>
    %25 = vector.extract_strided_slice %21 {offsets = [0, 64], sizes = [16, 64], strides = [1, 1]} : vector<16x128xf32> to vector<16x64xf32>
    %cst_21 = arith.constant 0.000000e+00 : f32
    %26 = vector.broadcast %cst_21 : f32 to vector<1x64xf32>
    %c0_22 = arith.constant 0 : index
    %c0_23 = arith.constant 0 : index
    %27 = vector.load %arg10[%c0_22, %c0_23] : memref<18x64xf32, #tpu.memory_space<vmem>>, vector<1x64xf32>
    tpu.vector_store %arg10[%c0_22, %c0_23], %26 {strides = array<i32>} : memref<18x64xf32, #tpu.memory_space<vmem>>, vector<1x64xf32>,
    %c17 = arith.constant 17 : index
    %c0_24 = arith.constant 0 : index
    %28 = vector.load %arg10[%c17, %c0_24] : memref<18x64xf32, #tpu.memory_space<vmem>>, vector<1x64xf32>
    tpu.vector_store %arg10[%c17, %c0_24], %26 {strides = array<i32>} : memref<18x64xf32, #tpu.memory_space<vmem>>, vector<1x64xf32>,
    %c1_25 = arith.constant 1 : index
    %c0_26 = arith.constant 0 : index
    %29 = vector.load %arg10[%c1_25, %c0_26] : memref<18x64xf32, #tpu.memory_space<vmem>>, vector<16x64xf32>
    tpu.vector_store %arg10[%c1_25, %c0_26], %24 {strides = array<i32>} : memref<18x64xf32, #tpu.memory_space<vmem>>, vector<16x64xf32>,
    %c0_27 = arith.constant 0 : index
    %c0_28 = arith.constant 0 : index
    %30 = vector.load %arg10[%c0_27, %c0_28] : memref<18x64xf32, #tpu.memory_space<vmem>>, vector<16x64xf32>
    %c0_29 = arith.constant 0 : index
    %c0_30 = arith.constant 0 : index
    %c0_31 = arith.constant 0 : index
    %31 = vector.load %arg4[%c0_29, %c0_30, %c0_31] : memref<3x64x64xf32, #tpu.memory_space<vmem>>, vector<1x64x64xf32>
    %32 = vector.shape_cast %31 : vector<1x64x64xf32> to vector<64x64xf32>
    %cst_32 = arith.constant dense<0.000000e+00> : vector<16x64xf32>
    %33 = tpu.matmul %30, %32, %cst_32 {dimension_numbers = #tpu.dot_dimension_numbers<[1], [0], [0], [1], [0, 0, 1, 1], [], []>} : vector<16x64xf32>, vector<64x64xf32>, vector<16x64xf32> -> vector<16x64xf32>
    %34 = arith.addf %25, %33 : vector<16x64xf32>
    %c1_33 = arith.constant 1 : index
    %c0_34 = arith.constant 0 : index
    %35 = vector.load %arg10[%c1_33, %c0_34] : memref<18x64xf32, #tpu.memory_space<vmem>>, vector<16x64xf32>
    %c1_35 = arith.constant 1 : index
    %c0_36 = arith.constant 0 : index
    %c0_37 = arith.constant 0 : index
    %36 = vector.load %arg4[%c1_35, %c0_36, %c0_37] : memref<3x64x64xf32, #tpu.memory_space<vmem>>, vector<1x64x64xf32>
    %37 = vector.shape_cast %36 : vector<1x64x64xf32> to vector<64x64xf32>
    %cst_38 = arith.constant dense<0.000000e+00> : vector<16x64xf32>
    %38 = tpu.matmul %35, %37, %cst_38 {dimension_numbers = #tpu.dot_dimension_numbers<[1], [0], [0], [1], [0, 0, 1, 1], [], []>} : vector<16x64xf32>, vector<64x64xf32>, vector<16x64xf32> -> vector<16x64xf32>
    %39 = arith.addf %34, %38 : vector<16x64xf32>
    %c2_39 = arith.constant 2 : index
    %c0_40 = arith.constant 0 : index
    %40 = vector.load %arg10[%c2_39, %c0_40] : memref<18x64xf32, #tpu.memory_space<vmem>>, vector<16x64xf32>
    %c2_41 = arith.constant 2 : index
    %c0_42 = arith.constant 0 : index
    %c0_43 = arith.constant 0 : index
    %41 = vector.load %arg4[%c2_41, %c0_42, %c0_43] : memref<3x64x64xf32, #tpu.memory_space<vmem>>, vector<1x64x64xf32>
    %42 = vector.shape_cast %41 : vector<1x64x64xf32> to vector<64x64xf32>
    %cst_44 = arith.constant dense<0.000000e+00> : vector<16x64xf32>
    %43 = tpu.matmul %40, %42, %cst_44 {dimension_numbers = #tpu.dot_dimension_numbers<[1], [0], [0], [1], [0, 0, 1, 1], [], []>} : vector<16x64xf32>, vector<64x64xf32>, vector<16x64xf32> -> vector<16x64xf32>
    %44 = arith.addf %39, %43 : vector<16x64xf32>
    %cst_45 = arith.constant 0.000000e+00 : f32
    %45 = vector.broadcast %cst_45 : f32 to vector<16x64xf32>
    %46 = arith.maximumf %44, %45 : vector<16x64xf32>
    %c0_46 = arith.constant 0 : index
    %c1_47 = arith.constant 1 : index
    %c0_48 = arith.constant 0 : index
    %47 = vector.load %arg1[%c0_46, %c1_47, %c0_48] : memref<1x18x64xf32, #tpu.memory_space<vmem>>, vector<1x16x64xf32>
    %48 = vector.shape_cast %47 : vector<1x16x64xf32> to vector<16x64xf32>
    %c0_49 = arith.constant 0 : index
    %c0_50 = arith.constant 0 : index
    %49 = vector.load %arg5[%c0_49, %c0_50] : memref<64x128xf32, #tpu.memory_space<vmem>>, vector<64x128xf32>
    %cst_51 = arith.constant dense<0.000000e+00> : vector<16x128xf32>
    %50 = tpu.matmul %48, %49, %cst_51 {dimension_numbers = #tpu.dot_dimension_numbers<[1], [0], [0], [1], [0, 0, 1, 1], [], []>} : vector<16x64xf32>, vector<64x128xf32>, vector<16x128xf32> -> vector<16x128xf32>
    %c0_52 = arith.constant 0 : index
    %c0_53 = arith.constant 0 : index
    %51 = vector.load %arg6[%c0_52, %c0_53] : memref<64x128xf32, #tpu.memory_space<vmem>>, vector<64x128xf32>
    %cst_54 = arith.constant dense<0.000000e+00> : vector<16x128xf32>
    %52 = tpu.matmul %24, %51, %cst_54 {dimension_numbers = #tpu.dot_dimension_numbers<[1], [0], [0], [1], [0, 0, 1, 1], [], []>} : vector<16x64xf32>, vector<64x128xf32>, vector<16x128xf32> -> vector<16x128xf32>
    %53 = arith.addf %50, %52 : vector<16x128xf32>
    %c0_55 = arith.constant 0 : index
    %c0_56 = arith.constant 0 : index
    %54 = vector.load %arg7[%c0_55, %c0_56] : memref<64x128xf32, #tpu.memory_space<vmem>>, vector<64x128xf32>
    %cst_57 = arith.constant dense<0.000000e+00> : vector<16x128xf32>
    %55 = tpu.matmul %46, %54, %cst_57 {dimension_numbers = #tpu.dot_dimension_numbers<[1], [0], [0], [1], [0, 0, 1, 1], [], []>} : vector<16x64xf32>, vector<64x128xf32>, vector<16x128xf32> -> vector<16x128xf32>
    %56 = arith.addf %53, %55 : vector<16x128xf32>
    %c0_58 = arith.constant 0 : index
    %c0_59 = arith.constant 0 : index
    %57 = vector.load %arg8[%c0_58, %c0_59] : memref<1x128xf32, #tpu.memory_space<vmem>>, vector<1x128xf32>
    %58 = vector.broadcast %57 : vector<1x128xf32> to vector<16x128xf32>
    %59 = arith.addf %56, %58 : vector<16x128xf32>
    %c0_60 = arith.constant 0 : index
    %c0_61 = arith.constant 0 : index
    %c0_62 = arith.constant 0 : index
    %60 = vector.load %arg9[%c0_60, %c0_61, %c0_62] : memref<1x16x128xf32, #tpu.memory_space<vmem>>, vector<1x16x128xf32>
    %61 = vector.shape_cast %60 : vector<1x16x128xf32> to vector<16x128xf32>
    %62 = vector.shape_cast %59 : vector<16x128xf32> to vector<1x16x128xf32>
    tpu.vector_store %arg9[%c0_60, %c0_61, %c0_62], %62 {strides = array<i32>} : memref<1x16x128xf32, #tpu.memory_space<vmem>>, vector<1x16x128xf32>,
    return
  }
  func.func @transform_0(%arg0: i32) -> (i32, i32, i32) {
    %c0_i32 = arith.constant 0 : i32
    %c0_i32_0 = arith.constant 0 : i32
    %c0_i32_1 = arith.constant 0 : i32
    return %arg0, %c0_i32, %c0_i32_0 : i32, i32, i32
  }
  func.func @transform_1(%arg0: i32) -> (i32, i32, i32) {
    %c0_i32 = arith.constant 0 : i32
    %c0_i32_0 = arith.constant 0 : i32
    %c0_i32_1 = arith.constant 0 : i32
    %c0_i32_2 = arith.constant 0 : i32
    return %c0_i32, %c0_i32_0, %c0_i32_1 : i32, i32, i32
  }
  func.func @transform_2(%arg0: i32) -> (i32, i32) {
    %c0_i32 = arith.constant 0 : i32
    %c0_i32_0 = arith.constant 0 : i32
    %c0_i32_1 = arith.constant 0 : i32
    return %c0_i32, %c0_i32_0 : i32, i32
  }
  func.func @transform_3(%arg0: i32) -> (i32, i32, i32) {
    %c0_i32 = arith.constant 0 : i32
    %c0_i32_0 = arith.constant 0 : i32
    %c0_i32_1 = arith.constant 0 : i32
    %c0_i32_2 = arith.constant 0 : i32
    return %c0_i32, %c0_i32_0, %c0_i32_1 : i32, i32, i32
  }
  func.func @transform_4(%arg0: i32) -> (i32, i32) {
    %c0_i32 = arith.constant 0 : i32
    %c0_i32_0 = arith.constant 0 : i32
    %c0_i32_1 = arith.constant 0 : i32
    return %c0_i32, %c0_i32_0 : i32, i32
  }
  func.func @transform_5(%arg0: i32) -> (i32, i32) {
    %c0_i32 = arith.constant 0 : i32
    %c0_i32_0 = arith.constant 0 : i32
    %c0_i32_1 = arith.constant 0 : i32
    return %c0_i32, %c0_i32_0 : i32, i32
  }
  func.func @transform_6(%arg0: i32) -> (i32, i32) {
    %c0_i32 = arith.constant 0 : i32
    %c0_i32_0 = arith.constant 0 : i32
    %c0_i32_1 = arith.constant 0 : i32
    return %c0_i32, %c0_i32_0 : i32, i32
  }
  func.func @transform_7(%arg0: i32) -> (i32, i32) {
    %c0_i32 = arith.constant 0 : i32
    %c0_i32_0 = arith.constant 0 : i32
    %c0_i32_1 = arith.constant 0 : i32
    return %c0_i32, %c0_i32_0 : i32, i32
  }
  func.func @transform_8(%arg0: i32) -> (i32, i32, i32) {
    %c0_i32 = arith.constant 0 : i32
    %c0_i32_0 = arith.constant 0 : i32
    %c0_i32_1 = arith.constant 0 : i32
    return %arg0, %c0_i32, %c0_i32_0 : i32, i32, i32
  }
}

</mosaic_0001>

<bundles_post_ra>
// kernel: tile.23
= control target key start
LH: loop header
LB: loop body
LE: loop exit
PB: predicated region body
PF: predicated region fallthrough
CT: control target
= control target key end

     0   :  { %s28_s0 = inlined_call_operand.vmem [shape: f32[4], index: 0, kind: input, shape index: {}]   ;;  %s29_s1 = inlined_call_operand.vmem [shape: f32[16,4], index: 1, kind: output, shape index: {}]  }
   0x1   :  { %v4_v0 = vld [vmem:[%s28_s0] ss:$0 sm:$0xff] }
   0x2   :  { %5 = vst [vmem:[%s29_s1] sm:$0xff] %v4_v0  ;;  %8 = vst [vmem:[%s29_s1 + $0x8] sm:$0xff] %v4_v0 }

// kernel: tile.24
= control target key start
LH: loop header
LB: loop body
LE: loop exit
PB: predicated region body
PF: predicated region fallthrough
CT: control target
= control target key end

     0   :  { %s131_s10 = smov 60   ;;  %s132_s11 = smov 52   ;;  %vm3_vm0 = vcmask 31744   ;;  %vm9_vm1 = vcmask 523744   ;;  %vm15_vm2 = vcmask 490944   ;;  %vm21_vm3 = vcmask 458144   ;;  %s207_s0 = inlined_call_operand.vmem [shape: f32[16,4], index: 0, kind: input, shape index: {}]   ;;  %s208_s1 = inlined_call_operand.vmem [shape: f32[64], index: 1, kind: output, shape index: {}]  }
   0x1   :  { %v101_v0 = vld [vmem:[%s207_s0 + $0xf] sm:$0x1]   ;;  %v103_v1 = vld [vmem:[%s207_s0 + $0xd] sm:$0x1]   ;;  %v102_v2 = vld [vmem:[%s207_s0 + $0xe] sm:$0x1]  }
   0x2   :  { %7 = vrot.lane.b32.xlu0 %v101_v0, %s131_s10  ;;  %19 = vrot.lane.b32.xlu1 %v103_v1, %s132_s11  ;;  %v104_v3 = vld [vmem:[%s207_s0 + $0xc] sm:$0x1]   ;;  %s133_s16 = smov 56   ;;  %s134_s17 = smov 48   ;;  %v105_v4 = vld [vmem:[%s207_s0 + $0xb] sm:$0x1]  }
   0x3   :  { %v106_v5 = vld [vmem:[%s207_s0 + $0xa] sm:$0x1]   ;;  %v2_v6 = vld [vmem:[%s207_s0] sm:$0x1]   ;;  %s135_s24 = smov 44   ;;  %s136_s25 = smov 40  }
   0x4   :  { %4 = vst.msk [vmem:[#allocation0] sm:$0x1] %vm3_vm0, %v2_v6   ;;  %v107_v7 = vld [vmem:[%s207_s0 + $0x9] sm:$0x1]   ;;  %v108_v8 = vld [vmem:[%s207_s0 + $0x8] sm:$0x1]  }
   0x5   :  { %s137_s30 = smov 36   ;;  %s138_s2 = smov 32   ;;  %v109_v9 = vld [vmem:[%s207_s0 + $0x7] sm:$0x1]   ;;  %v110_v10 = vld [vmem:[%s207_s0 + $0x6] sm:$0x1]  }
   0x6   :  { %13 = vrot.lane.b32.xlu0 %v102_v2, %s133_s16  ;;  %25 = vrot.lane.b32.xlu1 %v104_v3, %s134_s17  ;;  %s139_s7 = smov 28   ;;  %s140_s8 = smov 24   ;;  %v111_v11 = vld [vmem:[%s207_s0 + $0x5] sm:$0x1]   ;;  %v112_v12 = vld [vmem:[%s207_s0 + $0x4] sm:$0x1]  }
   0x7   :  { %s141_s13 = smov 20   ;;  %s142_s14 = smov 16   ;;  %v113_v13 = vld [vmem:[%s207_s0 + $0x3] sm:$0x1]   ;;  %v114_v14 = vld [vmem:[%s207_s0 + $0x2] sm:$0x1]  }
   0x8   :  { %s143_s19 = smov 12   ;;  %s144_s20 = smov 8   ;;  %v115_v15 = vld [vmem:[%s207_s0 + $0x1] sm:$0x1]   ;;  %vm27_vm4 = vcmask 425344   ;;  %vm33_vm5 = vcmask 392544  }
   0x9   :  { %s145_s0 = smov 4   ;;  %vm39_vm6 = vcmask 359744   ;;  %vm45_vm7 = vcmask 326944   ;;  %vm51_vm8 = vcmask 294144   ;;  %vm57_vm9 = vcmask 261344  }
   0xa   :  { %31 = vrot.lane.b32.xlu0 %v105_v4, %s135_s24  ;;  %37 = vrot.lane.b32.xlu1 %v106_v5, %s136_s25  ;;  %vm63_vm10 = vcmask 228544   ;;  %vm69_vm11 = vcmask 195744   ;;  %vm75_vm12 = vcmask 162944   ;;  %vm81_vm13 = vcmask 130144  }
   0xb   :  { %vm87_vm14 = vcmask 97344   ;;  %vm93_vm15 = vcmask 64544  }
   0xe   :  { %43 = vrot.lane.b32.xlu0 %v107_v7, %s137_s30  ;;  %49 = vrot.lane.b32.xlu1 %v108_v8, %s138_s2 }
  0x12   :  { %55 = vrot.lane.b32.xlu0 %v109_v9, %s139_s7  ;;  %61 = vrot.lane.b32.xlu1 %v110_v10, %s140_s8 }
  0x16   :  { %67 = vrot.lane.b32.xlu0 %v111_v11, %s141_s13  ;;  %73 = vrot.lane.b32.xlu1 %v112_v12, %s142_s14 }
  0x1a   :  { %79 = vrot.lane.b32.xlu0 %v113_v13, %s143_s19  ;;  %85 = vrot.lane.b32.xlu1 %v114_v14, %s144_s20 }
  0x1e   :  { %91 = vrot.lane.b32.xlu0 %v115_v15, %s145_s0 }
  0x74   :  { %v8_v16 = vpop.permute.xlu0 %7   ;;  %v20_v17 = vpop.permute.xlu1 %19  }
  0x75   :  { %10 = vst.msk [vmem:[#allocation0] sm:$0x1] %vm9_vm1, %v8_v16  }
  0x78   :  { %v14_v18 = vpop.permute.xlu0 %13   ;;  %v26_v19 = vpop.permute.xlu1 %25  }
  0x79   :  { %16 = vst.msk [vmem:[#allocation0] sm:$0x1] %vm15_vm2, %v14_v18  }
  0x7a   :  { %22 = vst.msk [vmem:[#allocation0] sm:$0x1] %vm21_vm3, %v20_v17  }
  0x7b   :  { %28 = vst.msk [vmem:[#allocation0] sm:$0x1] %vm27_vm4, %v26_v19  }
  0x7c   :  { %v32_v20 = vpop.permute.xlu0 %31   ;;  %v38_v21 = vpop.permute.xlu1 %37  }
  0x7d   :  { %34 = vst.msk [vmem:[#allocation0] sm:$0x1] %vm33_vm5, %v32_v20  }
  0x7e   :  { %40 = vst.msk [vmem:[#allocation0] sm:$0x1] %vm39_vm6, %v38_v21  }
  0x80   :  { %v44_v22 = vpop.permute.xlu0 %43   ;;  %v50_v23 = vpop.permute.xlu1 %49  }
  0x81   :  { %46 = vst.msk [vmem:[#allocation0] sm:$0x1] %vm45_vm7, %v44_v22  }
  0x82   :  { %52 = vst.msk [vmem:[#allocation0] sm:$0x1] %vm51_vm8, %v50_v23  }
  0x84   :  { %v56_v24 = vpop.permute.xlu0 %55   ;;  %v62_v25 = vpop.permute.xlu1 %61  }
  0x85   :  { %58 = vst.msk [vmem:[#allocation0] sm:$0x1] %vm57_vm9, %v56_v24  }
  0x86   :  { %64 = vst.msk [vmem:[#allocation0] sm:$0x1] %vm63_vm10, %v62_v25  }
  0x88   :  { %v68_v26 = vpop.permute.xlu0 %67   ;;  %v74_v27 = vpop.permute.xlu1 %73  }
  0x89   :  { %70 = vst.msk [vmem:[#allocation0] sm:$0x1] %vm69_vm11, %v68_v26  }
  0x8a   :  { %76 = vst.msk [vmem:[#allocation0] sm:$0x1] %vm75_vm12, %v74_v27  }
  0x8c   :  { %v80_v28 = vpop.permute.xlu0 %79   ;;  %v86_v29 = vpop.permute.xlu1 %85  }
  0x8d   :  { %82 = vst.msk [vmem:[#allocation0] sm:$0x1] %vm81_vm13, %v80_v28  }
  0x8e   :  { %88 = vst.msk [vmem:[#allocation0] sm:$0x1] %vm87_vm14, %v86_v29  }
  0x90   :  { %v92_v30 = vpop.permute.xlu0 %91  }
  0x91   :  { %94 = vst.msk [vmem:[#allocation0] sm:$0x1] %vm93_vm15, %v92_v30  }
  0x98   :  { %v98_v31 = vld [vmem:[#allocation0] sm:$0x1] }
  0x99   :  { %100 = vst [vmem:[%s208_s1] sm:$0x1] %v98_v31 }

// kernel: tile.28
= control target key start
LH: loop header
LB: loop body
LE: loop exit
PB: predicated region body
PF: predicated region fallthrough
CT: control target
= control target key end

     0   :  { %s28_s0 = inlined_call_operand.vmem [shape: f32[8], index: 0, kind: input, shape index: {}]   ;;  %s29_s1 = inlined_call_operand.vmem [shape: f32[16,8], index: 1, kind: output, shape index: {}]  }
   0x1   :  { %v4_v0 = vld [vmem:[%s28_s0] ss:$0 sm:$0xff] }
   0x2   :  { %5 = vst [vmem:[%s29_s1] sm:$0xff] %v4_v0  ;;  %8 = vst [vmem:[%s29_s1 + $0x8] sm:$0xff] %v4_v0 }

// kernel: tile.29
= control target key start
LH: loop header
LB: loop body
LE: loop exit
PB: predicated region body
PF: predicated region fallthrough
CT: control target
= control target key end

     0   :  { %s131_s10 = smov 120   ;;  %s132_s11 = smov 104   ;;  %vm3_vm0 = vcmask 64512   ;;  %vm9_vm1 = vcmask 1048512   ;;  %vm15_vm2 = vcmask 982912   ;;  %vm21_vm3 = vcmask 917312   ;;  %s207_s0 = inlined_call_operand.vmem [shape: f32[16,8], index: 0, kind: input, shape index: {}]   ;;  %s208_s1 = inlined_call_operand.vmem [shape: f32[1,128], index: 1, kind: output, shape index: {}]  }
   0x1   :  { %v101_v0 = vld [vmem:[%s207_s0 + $0xf] sm:$0x1]   ;;  %v103_v1 = vld [vmem:[%s207_s0 + $0xd] sm:$0x1]   ;;  %v102_v2 = vld [vmem:[%s207_s0 + $0xe] sm:$0x1]  }
   0x2   :  { %7 = vrot.lane.b32.xlu0 %v101_v0, %s131_s10  ;;  %19 = vrot.lane.b32.xlu1 %v103_v1, %s132_s11  ;;  %v104_v3 = vld [vmem:[%s207_s0 + $0xc] sm:$0x1]   ;;  %s133_s16 = smov 112   ;;  %s134_s17 = smov 96   ;;  %v105_v4 = vld [vmem:[%s207_s0 + $0xb] sm:$0x1]  }
   0x3   :  { %v106_v5 = vld [vmem:[%s207_s0 + $0xa] sm:$0x1]   ;;  %v2_v6 = vld [vmem:[%s207_s0] sm:$0x1]   ;;  %s135_s24 = smov 88   ;;  %s136_s25 = smov 80  }
   0x4   :  { %4 = vst.msk [vmem:[#allocation0] sm:$0x1] %vm3_vm0, %v2_v6   ;;  %v107_v7 = vld [vmem:[%s207_s0 + $0x9] sm:$0x1]   ;;  %v108_v8 = vld [vmem:[%s207_s0 + $0x8] sm:$0x1]  }
   0x5   :  { %s137_s30 = smov 72   ;;  %s138_s2 = smov 64   ;;  %v109_v9 = vld [vmem:[%s207_s0 + $0x7] sm:$0x1]   ;;  %v110_v10 = vld [vmem:[%s207_s0 + $0x6] sm:$0x1]  }
   0x6   :  { %13 = vrot.lane.b32.xlu0 %v102_v2, %s133_s16  ;;  %25 = vrot.lane.b32.xlu1 %v104_v3, %s134_s17  ;;  %s139_s7 = smov 56   ;;  %s140_s8 = smov 48   ;;  %v111_v11 = vld [vmem:[%s207_s0 + $0x5] sm:$0x1]   ;;  %v112_v12 = vld [vmem:[%s207_s0 + $0x4] sm:$0x1]  }
   0x7   :  { %s141_s13 = smov 40   ;;  %s142_s14 = smov 32   ;;  %v113_v13 = vld [vmem:[%s207_s0 + $0x3] sm:$0x1]   ;;  %v114_v14 = vld [vmem:[%s207_s0 + $0x2] sm:$0x1]  }
   0x8   :  { %s143_s19 = smov 24   ;;  %s144_s20 = smov 16   ;;  %v115_v15 = vld [vmem:[%s207_s0 + $0x1] sm:$0x1]   ;;  %vm27_vm4 = vcmask 851712   ;;  %vm33_vm5 = vcmask 786112  }
   0x9   :  { %s145_s0 = smov 8   ;;  %vm39_vm6 = vcmask 720512   ;;  %vm45_vm7 = vcmask 654912   ;;  %vm51_vm8 = vcmask 589312   ;;  %vm57_vm9 = vcmask 523712  }
   0xa   :  { %31 = vrot.lane.b32.xlu0 %v105_v4, %s135_s24  ;;  %37 = vrot.lane.b32.xlu1 %v106_v5, %s136_s25  ;;  %vm63_vm10 = vcmask 458112   ;;  %vm69_vm11 = vcmask 392512   ;;  %vm75_vm12 = vcmask 326912   ;;  %vm81_vm13 = vcmask 261312  }
   0xb   :  { %vm87_vm14 = vcmask 195712   ;;  %vm93_vm15 = vcmask 130112  }
   0xe   :  { %43 = vrot.lane.b32.xlu0 %v107_v7, %s137_s30  ;;  %49 = vrot.lane.b32.xlu1 %v108_v8, %s138_s2 }
  0x12   :  { %55 = vrot.lane.b32.xlu0 %v109_v9, %s139_s7  ;;  %61 = vrot.lane.b32.xlu1 %v110_v10, %s140_s8 }
  0x16   :  { %67 = vrot.lane.b32.xlu0 %v111_v11, %s141_s13  ;;  %73 = vrot.lane.b32.xlu1 %v112_v12, %s142_s14 }
  0x1a   :  { %79 = vrot.lane.b32.xlu0 %v113_v13, %s143_s19  ;;  %85 = vrot.lane.b32.xlu1 %v114_v14, %s144_s20 }
  0x1e   :  { %91 = vrot.lane.b32.xlu0 %v115_v15, %s145_s0 }
  0x74   :  { %v8_v16 = vpop.permute.xlu0 %7   ;;  %v20_v17 = vpop.permute.xlu1 %19  }
  0x75   :  { %10 = vst.msk [vmem:[#allocation0] sm:$0x1] %vm9_vm1, %v8_v16  }
  0x78   :  { %v14_v18 = vpop.permute.xlu0 %13   ;;  %v26_v19 = vpop.permute.xlu1 %25  }
  0x79   :  { %16 = vst.msk [vmem:[#allocation0] sm:$0x1] %vm15_vm2, %v14_v18  }
  0x7a   :  { %22 = vst.msk [vmem:[#allocation0] sm:$0x1] %vm21_vm3, %v20_v17  }
  0x7b   :  { %28 = vst.msk [vmem:[#allocation0] sm:$0x1] %vm27_vm4, %v26_v19  }
  0x7c   :  { %v32_v20 = vpop.permute.xlu0 %31   ;;  %v38_v21 = vpop.permute.xlu1 %37  }
  0x7d   :  { %34 = vst.msk [vmem:[#allocation0] sm:$0x1] %vm33_vm5, %v32_v20  }
  0x7e   :  { %40 = vst.msk [vmem:[#allocation0] sm:$0x1] %vm39_vm6, %v38_v21  }
  0x80   :  { %v44_v22 = vpop.permute.xlu0 %43   ;;  %v50_v23 = vpop.permute.xlu1 %49  }
  0x81   :  { %46 = vst.msk [vmem:[#allocation0] sm:$0x1] %vm45_vm7, %v44_v22  }
  0x82   :  { %52 = vst.msk [vmem:[#allocation0] sm:$0x1] %vm51_vm8, %v50_v23  }
  0x84   :  { %v56_v24 = vpop.permute.xlu0 %55   ;;  %v62_v25 = vpop.permute.xlu1 %61  }
  0x85   :  { %58 = vst.msk [vmem:[#allocation0] sm:$0x1] %vm57_vm9, %v56_v24  }
  0x86   :  { %64 = vst.msk [vmem:[#allocation0] sm:$0x1] %vm63_vm10, %v62_v25  }
  0x88   :  { %v68_v26 = vpop.permute.xlu0 %67   ;;  %v74_v27 = vpop.permute.xlu1 %73  }
  0x89   :  { %70 = vst.msk [vmem:[#allocation0] sm:$0x1] %vm69_vm11, %v68_v26  }
  0x8a   :  { %76 = vst.msk [vmem:[#allocation0] sm:$0x1] %vm75_vm12, %v74_v27  }
  0x8c   :  { %v80_v28 = vpop.permute.xlu0 %79   ;;  %v86_v29 = vpop.permute.xlu1 %85  }
  0x8d   :  { %82 = vst.msk [vmem:[#allocation0] sm:$0x1] %vm81_vm13, %v80_v28  }
  0x8e   :  { %88 = vst.msk [vmem:[#allocation0] sm:$0x1] %vm87_vm14, %v86_v29  }
  0x90   :  { %v92_v30 = vpop.permute.xlu0 %91  }
  0x91   :  { %94 = vst.msk [vmem:[#allocation0] sm:$0x1] %vm93_vm15, %v92_v30  }
  0x98   :  { %v98_v31 = vld [vmem:[#allocation0] sm:$0x1] }
  0x99   :  { %100 = vst [vmem:[%s208_s1] sm:$0x1] %v98_v31 }

// kernel: sym_dense_block_forward.1
= control target key start
LH: loop header
LB: loop body
LE: loop exit
PB: predicated region body
PF: predicated region fallthrough
CT: control target
= control target key end

     0   :  { %s1790_s27 = smov 0   ;;  %s2085_s0 = inlined_call_operand.vmem [shape: f32[2,18,64], index: 0, kind: input, shape index: {}]   ;;  %s2086_s1 = inlined_call_operand.vmem [shape: f32[3,64,128], index: 1, kind: input, shape index: {}]   ;;  %s2087_s2 = inlined_call_operand.vmem [shape: f32[1,128], index: 2, kind: input, shape index: {}]   ;;  %s2088_s3 = inlined_call_operand.vmem [shape: f32[3,64,64], index: 3, kind: input, shape index: {}]   ;;  %s2089_s4 = inlined_call_operand.vmem [shape: f32[64,128], index: 4, kind: input, shape index: {}]   ;;  %s2090_s5 = inlined_call_operand.vmem [shape: f32[64,128], index: 5, kind: input, shape index: {}]   ;;  %s2091_s6 = inlined_call_operand.vmem [shape: f32[64,128], index: 6, kind: input, shape index: {}]   ;;  %s2092_s7 = inlined_call_operand.vmem [shape: f32[1,128], index: 7, kind: input, shape index: {}]   ;;  %s2093_s8 = inlined_call_operand.vmem [shape: f32[2,16,128], index: 8, kind: output, shape index: {}]  }
   0x1 LB: > { %s1248_s28 = sadd.s32 4294967295, %s1741_s27   ;;  %p1252_p0 = scmp.ge.s32.totalorder %s1741_s27, 1  ;;  %s1741_s27 = sphi %s1790_s27, %s18_s27  }
   0x2   : > { %p262_p1 = scmp.lt.s32.totalorder %s1741_s27, 3 }
   0x4   : > { %p263_p2 = pnand %p1252_p0, %p262_p1 }
   0x5   : > { %v308_v0 = vld [vmem:[%s2086_s1] sm:$0xff] (!%p263_p2)  ;;  %v309_v1 = vld [vmem:[%s2086_s1 + $0x8] sm:$0xff] (!%p263_p2)  ;;  %v310_v2 = vld [vmem:[%s2086_s1 + $0x10] sm:$0xff] (!%p263_p2)  ;;  %p296_p3 = scmp.lt.s32.totalorder (!%p263_p2), %s1248_s28, 1  ;;  %vm327_vm0 = vcmask (!%p263_p2), 523264   ;;  %vm595_vm1 = vcmask (!%p263_p2), 516096  }
   0x6   : > { %266 = sbr.rel (%p263_p2) target bundleno = 964 (0x3c4), region = 52  ;;  %v1588_v3 = vpack.c.bf16 (!%p263_p2), %v309_v1, %v308_v0  ;;  %v311_v4 = vld [vmem:[%s2086_s1 + $0x18] sm:$0xff] (!%p263_p2)  ;;  %v312_v6 = vld [vmem:[%s2086_s1 + $0x20] sm:$0xff] (!%p263_p2)  ;;  %v313_v7 = vld [vmem:[%s2086_s1 + $0x28] sm:$0xff] (!%p263_p2)  ;;  %v1743_v63 = vmov (!%p263_p2), 0.0   ;;  %s1744_s26 = smov (!%p263_p2), 64  }
   0x7   : > { %v1592_v5 = vpack.c.bf16 (!%p263_p2), %v311_v4, %v310_v2  ;;  %v1256_v8 = vld [vmem:[%s2086_s1 + $0x40] sm:$0xff] (!%p263_p2)  ;;  %v1257_v9 = vld [vmem:[%s2086_s1 + $0x48] sm:$0xff] (!%p263_p2)  ;;  %v1258_v11 = vld [vmem:[%s2086_s1 + $0x50] sm:$0xff] (!%p263_p2)  ;;  %v1596_v13 = vpack.c.bf16 (!%p263_p2), %v313_v7, %v312_v6  ;;  %596 = vst.msk [vmem:[#allocation2] sm:$0x1] (!%p263_p2), %vm595_vm1, %v1743_v63 }
   0x8   : > { %1589 = vmatprep.subr.bf16.mxu0 (!%p263_p2), %v1588_v3  ;;  %v1572_v10 = vpack.c.bf16 (!%p263_p2), %v1257_v9, %v1256_v8  ;;  %v1259_v12 = vld [vmem:[%s2086_s1 + $0x58] sm:$0xff] (!%p263_p2)  ;;  %v1260_v15 = vld [vmem:[%s2086_s1 + $0x60] sm:$0xff] (!%p263_p2)  ;;  %v1261_v16 = vld [vmem:[%s2086_s1 + $0x68] sm:$0xff] (!%p263_p2)  ;;  %597 = vst.msk [vmem:[#allocation2 + $0x11] sm:$0x1] (!%p263_p2), %vm595_vm1, %v1743_v63 }
   0x9   : > { %1591 = vmatpush3.bf16.msra.mxu0 (!%p263_p2), %v1588_v3  ;;  %v1576_v14 = vpack.c.bf16 (!%p263_p2), %v1259_v12, %v1258_v11  ;;  %v314_v17 = vld [vmem:[%s2086_s1 + $0x30] sm:$0xff] (!%p263_p2)  ;;  %v315_v18 = vld [vmem:[%s2086_s1 + $0x38] sm:$0xff] (!%p263_p2)  ;;  %v1580_v20 = vpack.c.bf16 (!%p263_p2), %v1261_v16, %v1260_v15  ;;  %v1268_v25 = vld [vmem:[%s2086_s1 + $0x80] sm:$0xff] (!%p263_p2) }
   0xa   : > { %1593 = vmatprep.subr.bf16.mxu0 (!%p263_p2), %v1592_v5  ;;  %1573 = vmatprep.subr.bf16.mxu1 (!%p263_p2), %v1572_v10  ;;  %v1600_v22 = vpack.c.bf16 (!%p263_p2), %v315_v18, %v314_v17  ;;  %v1262_v23 = vld [vmem:[%s2086_s1 + $0x70] sm:$0xff] (!%p263_p2)  ;;  %v1263_v24 = vld [vmem:[%s2086_s1 + $0x78] sm:$0xff] (!%p263_p2)  ;;  %v1269_v26 = vld [vmem:[%s2086_s1 + $0x88] sm:$0xff] (!%p263_p2) }
   0xb   : > { %1575 = vmatpush3.bf16.msra.mxu1 (!%p263_p2), %v1572_v10  ;;  %v1584_v27 = vpack.c.bf16 (!%p263_p2), %v1263_v24, %v1262_v23  ;;  %v1604_v28 = vpack.c.bf16 (!%p263_p2), %v1269_v26, %v1268_v25  ;;  %v1270_v29 = vld [vmem:[%s2086_s1 + $0x90] sm:$0xff] (!%p263_p2)  ;;  %v1271_v30 = vld [vmem:[%s2086_s1 + $0x98] sm:$0xff] (!%p263_p2)  ;;  %v1272_v34 = vld [vmem:[%s2086_s1 + $0xa0] sm:$0xff] (!%p263_p2) }
   0xc   : > { %1577 = vmatprep.subr.bf16.mxu1 (!%p263_p2), %v1576_v14  ;;  %v1608_v32 = vpack.c.bf16 (!%p263_p2), %v1271_v30, %v1270_v29  ;;  %v1273_v35 = vld [vmem:[%s2086_s1 + $0xa8] sm:$0xff] (!%p263_p2)  ;;  %v1274_v38 = vld [vmem:[%s2086_s1 + $0xb0] sm:$0xff] (!%p263_p2)  ;;  %v1275_v39 = vld [vmem:[%s2086_s1 + $0xb8] sm:$0xff] (!%p263_p2) }
   0xd   : > { %s2095_s28 = smov (!%p296_p3, %s1248_s28), 1  ;;  %1595 = vmatpush3.bf16.msra.mxu0 %v1592_v5  ;;  %v1612_v37 = vpack.c.bf16 %v1273_v35, %v1272_v34  ;;  %v1616_v40 = vpack.c.bf16 %v1275_v39, %v1274_v38  ;;  %v917_v41 = vld [vmem:[%s2090_s5] sm:$0xff]  ;;  %v918_v42 = vld [vmem:[%s2090_s5 + $0x8] sm:$0xff]  ;;  %v919_v44 = vld [vmem:[%s2090_s5 + $0x10] sm:$0xff] }
   0xe   : > { %s1724_s23 = smul.u32 24, %s2095_s28  ;;  %1597 = vmatprep.subr.bf16.mxu0 %v1596_v13  ;;  %v1668_v43 = vpack.c.bf16 %v918_v42, %v917_v41  ;;  %v920_v45 = vld [vmem:[%s2090_s5 + $0x18] sm:$0xff]  ;;  %v602_v48 = vld [vmem:[%s2088_s3] sm:$0xff]  ;;  %v603_v49 = vld [vmem:[%s2088_s3 + $0x8] sm:$0xff]  ;;  %s1310_s20 = sshll.u32 %s2095_s28, 4 }
   0xf   : > { %1579 = vmatpush3.bf16.msra.mxu1 %v1576_v14  ;;  %v1672_v47 = vpack.c.bf16 %v920_v45, %v919_v44  ;;  %v1620_v50 = vpack.c.bf16 %v603_v49, %v602_v48  ;;  %v921_v51 = vld [vmem:[%s2090_s5 + $0x20] sm:$0xff]  ;;  %v922_v52 = vld [vmem:[%s2090_s5 + $0x28] sm:$0xff]  ;;  %v604_v54 = vld [vmem:[%s2088_s3 + $0x10] sm:$0xff]  ;;  %s305_s25 = scalar_lea.vmem %s2093_s8, %s1310_s20 }
  0x10   : > { %s1846_s18 = scalar_lea.vmem %s2085_s0, %s1724_s23  ;;  %1581 = vmatprep.subr.bf16.mxu1 %v1580_v20  ;;  %v1676_v53 = vpack.c.bf16 %v922_v52, %v921_v51  ;;  %v605_v55 = vld [vmem:[%s2088_s3 + $0x18] sm:$0xff]  ;;  %v923_v57 = vld [vmem:[%s2090_s5 + $0x30] sm:$0xff]  ;;  %v606_v60 = vld [vmem:[%s2088_s3 + $0x20] sm:$0xff] }
  0x11   : > { %v306_v19 = vld [vmem:[%s1846_s18] sm:$0xff]  ;;  %1599 = vmatpush3.bf16.msra.mxu0 %v1596_v13  ;;  %v307_v31 = vld [vmem:[%s1846_s18 + $0x8] sm:$0xff]  ;;  %v1624_v56 = vpack.c.bf16 %v605_v55, %v604_v54  ;;  %v924_v58 = vld [vmem:[%s2090_s5 + $0x38] sm:$0xff] }
  0x12   : > { %1436 = vmatprep.mubr.msk.f32.mxu0 %vm327_vm0, %v306_v19  ;;  %v1851_v21 = vld [vmem:[%s1846_s18 + $0x1] sm:$0xff]  ;;  %1601 = vmatprep.subr.bf16.mxu0 %v1600_v22  ;;  %v1883_v36 = vld [vmem:[%s1846_s18 + $0x9] sm:$0xff]  ;;  %v1680_v59 = vpack.c.bf16 %v924_v58, %v923_v57  ;;  %v609_v1 = vld [vmem:[%s2088_s3 + $0x38] sm:$0xff] }
  0x13   : > { %1417 = vmatprep.mubr.msk.f32.mxu1 %vm327_vm0, %v1851_v21  ;;  %1583 = vmatpush3.bf16.msra.mxu1 %v1580_v20  ;;  %v490_v33 = vld [vmem:[%s1846_s18 + $0x2] sm:$0xff]  ;;  %v491_v46 = vld [vmem:[%s1846_s18 + $0xa] sm:$0xff]  ;;  %v1278_v9 = vld [vmem:[%s2087_s2] ss:$0 sm:$0xff] }
  0x14   : > { %1585 = vmatprep.subr.bf16.mxu1 %v1584_v27  ;;  %v607_v61 = vld [vmem:[%s2088_s3 + $0x28] sm:$0xff]  ;;  %v608_v0 = vld [vmem:[%s2088_s3 + $0x30] sm:$0xff]  ;;  %v1281_v3 = vld [vmem:[%s2088_s3 + $0x40] sm:$0xff] }
  0x15   : > { %1603 = vmatpush3.bf16.msra.mxu0 %v1600_v22  ;;  %v1628_v62 = vpack.c.bf16 %v607_v61, %v606_v60  ;;  %v1632_v2 = vpack.c.bf16 %v609_v1, %v608_v0  ;;  %v1282_v4 = vld [vmem:[%s2088_s3 + $0x48] sm:$0xff]  ;;  %v1283_v17 = vld [vmem:[%s2088_s3 + $0x50] sm:$0xff]  ;;  %v1284_v18 = vld [vmem:[%s2088_s3 + $0x58] sm:$0xff] }
  0x16   : > { %1605 = vmatprep.subr.bf16.mxu0 %v1604_v28  ;;  %v1636_v5 = vpack.c.bf16 %v1282_v4, %v1281_v3  ;;  %v1640_v22 = vpack.c.bf16 %v1284_v18, %v1283_v17  ;;  %v1285_v23 = vld [vmem:[%s2088_s3 + $0x60] sm:$0xff]  ;;  %v1287_v26 = vld [vmem:[%s2088_s3 + $0x70] sm:$0xff]  ;;  %v1292_v30 = vld [vmem:[%s2088_s3 + $0x88] sm:$0xff] }
  0x17   : > { %1587 = vmatpush3.bf16.msra.mxu1 %v1584_v27  ;;  %v1288_v27 = vld [vmem:[%s2088_s3 + $0x78] sm:$0xff]  ;;  %v1291_v29 = vld [vmem:[%s2088_s3 + $0x80] sm:$0xff]  ;;  %v1296_v38 = vld [vmem:[%s2088_s3 + $0xa8] sm:$0xff] }
  0x18   : > { %1437 = vmatmul.mubr.msk.f32.vlgmr.msra.gmra.mrb[0].mxu0 %vm327_vm0, %v307_v31  ;;  %1621 = vmatprep.subr.bf16.mxu1 %v1620_v50  ;;  %v1652_v31 = vpack.c.bf16 %v1292_v30, %v1291_v29  ;;  %v1297_v41 = vld [vmem:[%s2088_s3 + $0xb0] sm:$0xff]  ;;  %v1298_v42 = vld [vmem:[%s2088_s3 + $0xb8] sm:$0xff]  ;;  %v909_v49 = vld [vmem:[%s2089_s4] sm:$0xff] }
  0x19   : > { %1607 = vmatpush3.bf16.msra.mxu0 %v1604_v28  ;;  %1455 = vmatprep.mubr.msk.f32.mxu0 %vm327_vm0, %v490_v33  ;;  %v1648_v28 = vpack.c.bf16 %v1288_v27, %v1287_v26  ;;  %v1294_v33 = vld [vmem:[%s2088_s3 + $0x98] sm:$0xff]  ;;  %v911_v51 = vld [vmem:[%s2089_s4 + $0x10] sm:$0xff]  ;;  %v913_v55 = vld [vmem:[%s2089_s4 + $0x20] sm:$0xff] }
  0x1a   : > { %1609 = vmatprep.subr.bf16.mxu0 %v1608_v32  ;;  %1418 = vmatmul.mubr.msk.f32.vlgmr.msra.gmra.mrb[0].mxu1 %vm327_vm0, %v1883_v36  ;;  %v915_v58 = vld [vmem:[%s2089_s4 + $0x30] sm:$0xff]  ;;  %v1087_v63 = vld [vmem:[%s2091_s6] sm:$0xff]  ;;  %v1088_v0 = vld [vmem:[%s2091_s6 + $0x8] sm:$0xff] }
  0x1b   : > { %1623 = vmatpush3.bf16.msra.mxu1 %v1620_v50  ;;  %v910_v50 = vld [vmem:[%s2089_s4 + $0x8] sm:$0xff]  ;;  %v1700_v1 = vpack.c.bf16 %v1088_v0, %v1087_v63  ;;  %v1090_v3 = vld [vmem:[%s2091_s6 + $0x18] sm:$0xff] }
  0x1c   : > { %1625 = vmatprep.subr.bf16.mxu1 %v1624_v56  ;;  %v1684_v52 = vpack.c.bf16 %v910_v50, %v909_v49 }
  0x1d   : > { %1611 = vmatpush3.bf16.msra.mxu0 %v1608_v32  ;;  %v1293_v32 = vld [vmem:[%s2088_s3 + $0x90] sm:$0xff] }
  0x1e   : > { %1613 = vmatprep.subr.bf16.mxu0 %v1612_v37  ;;  %v1656_v34 = vpack.c.bf16 %v1294_v33, %v1293_v32 }
  0x1f   : > { %1627 = vmatpush3.bf16.msra.mxu1 %v1624_v56  ;;  %v914_v56 = vld [vmem:[%s2089_s4 + $0x28] sm:$0xff] }
  0x20   : > { %1629 = vmatprep.subr.bf16.mxu1 %v1628_v62  ;;  %v1692_v57 = vpack.c.bf16 %v914_v56, %v913_v55 }
  0x21   : > { %1615 = vmatpush3.bf16.msra.mxu0 %v1612_v37  ;;  %v1295_v37 = vld [vmem:[%s2088_s3 + $0xa0] sm:$0xff] }
  0x22   : > { %1617 = vmatprep.subr.bf16.mxu0 %v1616_v40 }
  0x23   : > { %1631 = vmatpush3.bf16.msra.mxu1 %v1628_v62 }
  0x24   : > { %1633 = vmatprep.subr.bf16.mxu1 %v1632_v2 }
  0x25   : > { %1619 = vmatpush3.bf16.msra.mxu0 %v1616_v40  ;;  %v1660_v40 = vpack.c.bf16 %v1296_v38, %v1295_v37 }
  0x26   : > { %1669 = vmatprep.subr.bf16.mxu0 %v1668_v43 }
  0x27   : > { %1635 = vmatpush3.bf16.msra.mxu1 %v1632_v2  ;;  %v1089_v2 = vld [vmem:[%s2091_s6 + $0x10] sm:$0xff] }
  0x28   : > { %1456 = vmatmul.mubr.msk.f32.vlgmr.msra.gmra.mrb[0].mxu0 %vm327_vm0, %v491_v46  ;;  %1637 = vmatprep.subr.bf16.mxu1 %v1636_v5  ;;  %v1704_v4 = vpack.c.bf16 %v1090_v3, %v1089_v2 }
  0x29   : > { %1671 = vmatpush3.bf16.msra.mxu0 %v1668_v43  ;;  %v1664_v43 = vpack.c.bf16 %v1298_v42, %v1297_v41 }
  0x2a   : > { %1673 = vmatprep.subr.bf16.mxu0 %v1672_v47 }
  0x2d   : > { %1675 = vmatpush3.bf16.msra.mxu0 %v1672_v47 }
  0x2e   : > { %1677 = vmatprep.subr.bf16.mxu0 %v1676_v53 }
  0x31   : > { %1679 = vmatpush3.bf16.msra.mxu0 %v1676_v53  ;;  %v912_v53 = vld [vmem:[%s2089_s4 + $0x18] sm:$0xff] }
  0x32   : > { %1681 = vmatprep.subr.bf16.mxu0 %v1680_v59  ;;  %v1688_v54 = vpack.c.bf16 %v912_v53, %v911_v51 }
  0x35   : > { %1683 = vmatpush3.bf16.msra.mxu0 %v1680_v59  ;;  %v916_v59 = vld [vmem:[%s2089_s4 + $0x38] sm:$0xff] }
  0x36   : > { %1685 = vmatprep.subr.bf16.mxu0 %v1684_v52  ;;  %v1696_v62 = vpack.c.bf16 %v916_v59, %v915_v58 }
  0xed   : > { %v1419_v6 = vpop.f32.mrb[0].mxu1 }
  0xee   : > { %v400_v7 = vpop.f32.mrb[1].mxu1 }
  0xfb   : > { %v1457_v8 = vpop.f32.mrb[0].mxu0 }
  0xfc   : > { %v1716_v10 = vadd.f32 %v1457_v8, %v1419_v6  ;;  %v573_v11 = vpop.f32.mrb[1].mxu0  ;;  %v1092_v6 = vld [vmem:[%s2091_s6 + $0x28] sm:$0xff]  ;;  %v1093_v8 = vld [vmem:[%s2091_s6 + $0x30] sm:$0xff] }
  0xfd   : > { %v1717_v12 = vadd.f32 %v573_v11, %v400_v7 }
  0xfe   : > { %v1953_v13 = vadd.f32 %v1716_v10, %v1278_v9 }
  0xff   : > { %v1955_v14 = vadd.f32 %v1717_v12, %v1278_v9  ;;  %v1094_v9 = vld [vmem:[%s2091_s6 + $0x38] sm:$0xff] }
 0x100   : > { %v594_v15 = vmax.f32 %v1953_v13, 0.0  ;;  %v1712_v10 = vpack.c.bf16 %v1094_v9, %v1093_v8 }
 0x101   : > { %v593_v16 = vmax.f32 %v1955_v14, 0.0 }
 0x102   : > { %599 = vst.msk [vmem:[#allocation2 + $0x9] sm:$0xff] %vm327_vm0, %v594_v15 }
 0x103   : > { %598 = vst.msk [vmem:[#allocation2 + $0x1] sm:$0xff] %vm327_vm0, %v593_v16  ;;  %1531 = vmatprep.mubr.msk.f32.mxu0 %vm327_vm0, %v593_v16 }
 0x104   : > { %1532 = vmatmul.mubr.msk.f32.vlgmr.msra.gmra.mrb[2].mxu0 %vm327_vm0, %v594_v15 }
 0x105   : > { %1550 = vmatprep.mubr.msk.f32.mxu0 %vm327_vm0, %v1851_v21  ;;  %v1286_v21 = vld [vmem:[%s2088_s3 + $0x68] sm:$0xff]  ;;  %1687 = vmatpush3.bf16.msra.mxu0 %v1684_v52 }
 0x106   : > { %v1644_v25 = vpack.c.bf16 %v1286_v21, %v1285_v23  ;;  %1689 = vmatprep.subr.bf16.mxu0 %v1688_v54 }
 0x109   : > { %v702_v35 = vld [vmem:[#allocation2 + $0x9] sm:$0xff]  ;;  %1691 = vmatpush3.bf16.msra.mxu0 %v1688_v54 }
 0x10a   : > { %v600_v19 = vld [vmem:[#allocation2] sm:$0xff]  ;;  %v601_v20 = vld [vmem:[#allocation2 + $0x8] sm:$0xff]  ;;  %1693 = vmatprep.subr.bf16.mxu0 %v1692_v57 }
 0x10b   : > { %1474 = vmatprep.mubr.msk.f32.mxu1 %vm327_vm0, %v600_v19  ;;  %v701_v24 = vld [vmem:[#allocation2 + $0x1] sm:$0xff]  ;;  %v804_v44 = vld [vmem:[#allocation2 + $0xa] sm:$0xff] }
 0x10c   : > { %1475 = vmatmul.mubr.msk.f32.vlgmr.msra.gmra.mrb[2].mxu1 %vm327_vm0, %v601_v20  ;;  %v803_v39 = vld [vmem:[#allocation2 + $0x2] sm:$0xff] }
 0x10d   : > { %1639 = vmatpush3.bf16.msra.mxu1 %v1636_v5  ;;  %1493 = vmatprep.mubr.msk.f32.mxu1 %vm327_vm0, %v701_v24  ;;  %v1091_v5 = vld [vmem:[%s2091_s6 + $0x20] sm:$0xff] }
 0x10e   : > { %1641 = vmatprep.subr.bf16.mxu1 %v1640_v22  ;;  %1695 = vmatpush3.bf16.msra.mxu0 %v1692_v57  ;;  %v1708_v7 = vpack.c.bf16 %v1092_v6, %v1091_v5 }
 0x10f   : > { %1697 = vmatprep.subr.bf16.mxu0 %v1696_v62 }
 0x111   : > { %1643 = vmatpush3.bf16.msra.mxu1 %v1640_v22 }
 0x112   : > { %1645 = vmatprep.subr.bf16.mxu1 %v1644_v25  ;;  %1699 = vmatpush3.bf16.msra.mxu0 %v1696_v62 }
 0x113   : > { %1701 = vmatprep.subr.bf16.mxu0 %v1700_v1 }
 0x115   : > { %1647 = vmatpush3.bf16.msra.mxu1 %v1644_v25  ;;  %1551 = vmatmul.mubr.msk.f32.vlgmr.msra.gmra.mrb[2].mxu0 %vm327_vm0, %v1883_v36 }
 0x116   : > { %1649 = vmatprep.subr.bf16.mxu1 %v1648_v28  ;;  %1703 = vmatpush3.bf16.msra.mxu0 %v1700_v1 }
 0x117   : > { %1705 = vmatprep.subr.bf16.mxu0 %v1704_v4 }
 0x119   : > { %1651 = vmatpush3.bf16.msra.mxu1 %v1648_v28 }
 0x11a   : > { %1653 = vmatprep.subr.bf16.mxu1 %v1652_v31  ;;  %1707 = vmatpush3.bf16.msra.mxu0 %v1704_v4 }
 0x11b   : > { %1709 = vmatprep.subr.bf16.mxu0 %v1708_v7 }
 0x11c   : > { %1494 = vmatmul.mubr.msk.f32.vlgmr.msra.gmra.mrb[4].mxu1 %vm327_vm0, %v702_v35 }
 0x11d   : > { %1655 = vmatpush3.bf16.msra.mxu1 %v1652_v31  ;;  %1512 = vmatprep.mubr.msk.f32.mxu1 %vm327_vm0, %v803_v39 }
 0x11e   : > { %1657 = vmatprep.subr.bf16.mxu1 %v1656_v34  ;;  %1711 = vmatpush3.bf16.msra.mxu0 %v1708_v7 }
 0x11f   : > { %1713 = vmatprep.subr.bf16.mxu0 %v1712_v10 }
 0x121   : > { %1659 = vmatpush3.bf16.msra.mxu1 %v1656_v34 }
 0x122   : > { %1661 = vmatprep.subr.bf16.mxu1 %v1660_v40  ;;  %1715 = vmatpush3.bf16.msra.mxu0 %v1712_v10 }
 0x125   : > { %1663 = vmatpush3.bf16.msra.mxu1 %v1660_v40 }
 0x126   : > { %1665 = vmatprep.subr.bf16.mxu1 %v1664_v43 }
 0x129   : > { %1667 = vmatpush3.bf16.msra.mxu1 %v1664_v43 }
 0x12c   : > { %1513 = vmatmul.mubr.msk.f32.vlgmr.msra.gmra.mrb[6].mxu1 %vm327_vm0, %v804_v44 }
 0x1df   : > { %v1476_v45 = vpop.f32.mrb[2].mxu1 }
 0x1e0   : > { %695 = vrot.lane.b32.xlu0 %v1476_v45, %s1744_s26  ;;  %v682_v46 = vpop.f32.mrb[3].mxu1 }
 0x1e4   : > { %693 = vrot.lane.b32.xlu0 %v682_v46, %s1744_s26 }
 0x1ef   : > { %v1495_v47 = vpop.f32.mrb[4].mxu1 }
 0x1f0   : > { %797 = vrot.lane.b32.xlu1 %v1495_v47, %s1744_s26  ;;  %v784_v48 = vpop.f32.mrb[5].mxu1 }
 0x1f4   : > { %795 = vrot.lane.b32.xlu1 %v784_v48, %s1744_s26 }
 0x1ff   : > { %v1514_v60 = vpop.f32.mrb[6].mxu1 }
 0x200   : > { %899 = vrot.lane.b32.xlu1 %v1514_v60, %s1744_s26  ;;  %v886_v61 = vpop.f32.mrb[7].mxu1 }
 0x201   : > { %897 = vrot.lane.b32.xlu0 %v886_v61, %s1744_s26 }
 0x252   : > { %v696_v11 = vpop.permute.xlu0 %695 }
 0x253   : > { %v700_v16 = vadd.f32 %v696_v11, %v1953_v13  ;;  %v1307_v13 = vld [vmem:[%s2092_s7] ss:$0 sm:$0xff] }
 0x256   : > { %v694_v36 = vpop.permute.xlu0 %693 }
 0x257   : > { %v699_v17 = vadd.f32 %v694_v36, %v1955_v14 }
 0x262   : > { %v798_v12 = vpop.permute.xlu1 %797 }
 0x263   : > { %v802_v18 = vadd.f32 %v798_v12, %v700_v16 }
 0x266   : > { %v796_v15 = vpop.permute.xlu1 %795 }
 0x267   : > { %v801_v19 = vadd.f32 %v796_v15, %v699_v17 }
 0x272   : > { %v900_v20 = vpop.permute.xlu1 %899 }
 0x273   : > { %v904_v22 = vadd.f32 %v900_v20, %v802_v18  ;;  %v898_v23 = vpop.permute.xlu0 %897 }
 0x274   : > { %v903_v21 = vadd.f32 %v898_v23, %v801_v19 }
 0x275   : > { %v906_v24 = vmax.f32 %v904_v22, 0.0 }
 0x276   : > { %v905_v25 = vmax.f32 %v903_v21, 0.0 }
 0x277   : > { %1099 = vrot.lane.b32.xlu1 %v906_v24, %s1744_s26 }
 0x278   : > { %1097 = vrot.lane.b32.xlu0 %v905_v25, %s1744_s26 }
 0x2e9   : > { %v1100_v27 = vpop.permute.xlu1 %1099 }
 0x2ea   : > { %v1098_v26 = vpop.permute.xlu0 %1097 }
 0x2eb   : > { %1569 = vmatprep.mubr.msk.f32.mxu0 %vm327_vm0, %v1098_v26 }
 0x2ec   : > { %1570 = vmatmul.mubr.msk.f32.vlgmr.msra.gmra.mrb[2].mxu0 %vm327_vm0, %v1100_v27 }
 0x3bf   : > { %v1571_v14 = vpop.f32.mrb[2].mxu0 }
 0x3c0   : > { %v1190_v28 = vadd.f32 %v1571_v14, %v1307_v13  ;;  %v1171_v29 = vpop.f32.mrb[3].mxu0 }
 0x3c1   : > { %v1189_v30 = vadd.f32 %v1307_v13, %v1171_v29 }
 0x3c2   : > { %1192 = vst [vmem:[%s305_s25 + $0x8] sm:$0xff] %v1190_v28 }
 0x3c3   : > { %1191 = vst [vmem:[%s305_s25] sm:$0xff] %v1189_v30 }
 0x3c4 PF: > { %s18_s27 = sadd.s32 1, %s1741_s27  }
 0x3c5   : > { %p15_p4 = scmp.ge.s32.totalorder %s18_s27, 4  }
 0x3c7   :  { %17 = sbr.rel (!%p15_p4) target bundleno = 1 (0x1), region = 86 }

</bundles_post_ra>
